<compile_context>
chip_gen: v6e
topology: v6e:2x2x1
jax: 0.10.0
libtpu: 0.0.40
codegen_flags: <defaults>
</compile_context>

<pallas_src>
import functools

import jax
import jax.numpy as jnp
from jax import lax
from jax.experimental import pallas as pl
from jax.experimental.pallas import tpu as pltpu


# ----------------------------- Pallas kernels ------------------------------

def conv_bn_stats_kernel(p_ref, w_ref, b_ref, y_ref, sum_ref, sq_ref, acc_ref,
                         *, tm, m_valid, masked):
    """Grid = (rows, K-tiles).  MXU matmul with f32 accumulation; on the last
    K step add the bias, emit y (bf16) and accumulate the BN statistics."""
    i = pl.program_id(0)
    k = pl.program_id(1)
    nk = pl.num_programs(1)

    # init the resident stats accumulators once, at the very first grid point
    @pl.when((i == 0) & (k == 0))
    def _():
        sum_ref[...] = jnp.zeros_like(sum_ref)
        sq_ref[...] = jnp.zeros_like(sq_ref)

    # init the per-row-tile f32 accumulator at the first K step
    @pl.when(k == 0)
    def _():
        acc_ref[...] = jnp.zeros_like(acc_ref)

    acc_ref[...] += jnp.dot(p_ref[...], w_ref[...],
                            preferred_element_type=jnp.float32)

    # epilogue on the last K step: bias, store y, accumulate stats
    @pl.when(k == nk - 1)
    def _():
        y = acc_ref[...] + b_ref[...]                       # f32 [tm, Cp]
        y_ref[...] = y.astype(y_ref.dtype)
        if masked:
            rows = i * tm + lax.broadcasted_iota(jnp.int32, (tm, 1), 0)
            ys = jnp.where(rows < m_valid, y, 0.0)
        else:
            ys = y
        sum_ref[...] += jnp.sum(ys, axis=0, keepdims=True)
        sq_ref[...] += jnp.sum(ys * ys, axis=0, keepdims=True)


def bn_lrelu_kernel(y_ref, scale_ref, shift_ref, o_ref, *, negative_slope):
    """Fused BN affine + LeakyReLU(0.2) over a lane-dense [tm, Cp] tile."""
    z = y_ref[...].astype(jnp.float32) * scale_ref[...] + shift_ref[...]
    o_ref[...] = jnp.where(z >= 0, z, negative_slope * z)


# ------------------------------- wrapper -----------------------------------

def _round_up(a, m):
    return (a + m - 1) // m * m


def dcgan_conv_forward(x, w, b, gamma, beta, *, eps=1e-5, negative_slope=0.2):
    """x: [N, Cin, H, W] float32. Returns [N, Cout, H//2, W//2] float32."""
    N, Cin, H, W = x.shape
    Cout = w.shape[0]
    Ho, Wo = H // 2, W // 2

    # --- XLA glue: im2col for kernel=4, stride=2, pad=1 ---
    xp = jnp.pad(x, ((0, 0), (0, 0), (1, 1), (1, 1)))
    cols = []
    for kh in range(4):
        for kw in range(4):
            cols.append(xp[:, :, kh:kh + 2 * Ho:2, kw:kw + 2 * Wo:2])  # [N,Cin,Ho,Wo]
    patches = jnp.stack(cols, axis=-1)                  # [N,Cin,Ho,Wo,16]
    patches = jnp.transpose(patches, (0, 2, 3, 1, 4))   # [N,Ho,Wo,Cin,16]

    M = N * Ho * Wo
    K = Cin * 16

    # --- padded / tiled sizes (lane-dense channels, K-tiling, row tiling) ---
    Cp = _round_up(Cout, 128)                 # lane-dense output channels
    Kp = _round_up(K, 128)                    # lane-dense contraction dim
    tm = min(512, _round_up(M, 16))           # row tile (bf16-friendly)
    Mp = _round_up(M, tm)
    tk = next(c for c in (2048, 1024, 512, 256, 128) if Kp % c == 0)
    grid_m = Mp // tm
    grid_k = Kp // tk

    # bf16 MXU operands (f32 accumulation inside the kernel)
    P = patches.reshape(M, K)
    P = jnp.pad(P, ((0, Mp - M), (0, Kp - K))).astype(jnp.bfloat16)      # [Mp, Kp]
    Wm = w.reshape(Cout, K).T
    Wm = jnp.pad(Wm, ((0, Kp - K), (0, Cp - Cout))).astype(jnp.bfloat16)  # [Kp, Cp]
    bias = jnp.pad(b.astype(jnp.float32), (0, Cp - Cout)).reshape(1, Cp)

    vmem_limit = 48 * 1024 * 1024  # below v7x's 64 MiB physical, >> default scoped

    # --- fused conv (matmul) + bias + BN-statistics kernel ---
    conv_kernel = functools.partial(
        conv_bn_stats_kernel, tm=tm, m_valid=M, masked=(Mp != M))

    y, s, sq = pl.pallas_call(
        conv_kernel,
        out_shape=(
            jax.ShapeDtypeStruct((Mp, Cp), jnp.bfloat16),   # y slab (bf16)
            jax.ShapeDtypeStruct((1, Cp), jnp.float32),     # sum
            jax.ShapeDtypeStruct((1, Cp), jnp.float32),     # sum of squares
        ),
        grid_spec=pltpu.PrefetchScalarGridSpec(
            num_scalar_prefetch=0,
            grid=(grid_m, grid_k),
            in_specs=[
                pl.BlockSpec((tm, tk), lambda i, k: (i, k)),
                pl.BlockSpec((tk, Cp), lambda i, k: (k, 0)),
                pl.BlockSpec((1, Cp), lambda i, k: (0, 0)),
            ],
            out_specs=[
                pl.BlockSpec((tm, Cp), lambda i, k: (i, 0)),
                pl.BlockSpec((1, Cp), lambda i, k: (0, 0)),
                pl.BlockSpec((1, Cp), lambda i, k: (0, 0)),
            ],
            scratch_shapes=[pltpu.VMEM((tm, Cp), jnp.float32)],
        ),
        # stats outputs are resident accumulators across both axes -> arbitrary
        compiler_params=pltpu.CompilerParams(
            dimension_semantics=("arbitrary", "arbitrary"),
            vmem_limit_bytes=vmem_limit,
        ),
    )(P, Wm, bias)

    # --- tiny per-channel math in XLA (PyTorch BN training-mode: biased var) ---
    mean = s / float(M)
    var = jnp.maximum(sq / float(M) - mean * mean, 0.0)
    gamma_p = jnp.pad(gamma.astype(jnp.float32), (0, Cp - Cout)).reshape(1, Cp)
    beta_p = jnp.pad(beta.astype(jnp.float32), (0, Cp - Cout)).reshape(1, Cp)
    scale = gamma_p * lax.rsqrt(var + eps)
    shift = beta_p - mean * scale

    # --- fused BN affine + LeakyReLU(0.2) elementwise kernel (row-parallel) ---
    out = pl.pallas_call(
        functools.partial(bn_lrelu_kernel, negative_slope=negative_slope),
        out_shape=jax.ShapeDtypeStruct((Mp, Cp), jnp.float32),
        grid_spec=pltpu.PrefetchScalarGridSpec(
            num_scalar_prefetch=0,
            grid=(grid_m,),
            in_specs=[
                pl.BlockSpec((tm, Cp), lambda i: (i, 0)),
                pl.BlockSpec((1, Cp), lambda i: (0, 0)),
                pl.BlockSpec((1, Cp), lambda i: (0, 0)),
            ],
            out_specs=pl.BlockSpec((tm, Cp), lambda i: (i, 0)),
        ),
        compiler_params=pltpu.CompilerParams(
            dimension_semantics=("parallel",),
            vmem_limit_bytes=vmem_limit,
        ),
    )(y, scale, shift)

    # drop padding, back to NCHW
    out = out[:M, :Cout].reshape(N, Ho, Wo, Cout)
    return jnp.transpose(out, (0, 3, 1, 2))


# ------------------------------ reference ----------------------------------

def dcgan_conv_reference(x, w, b, gamma, beta, *, eps=1e-5, negative_slope=0.2):
    y = lax.conv_general_dilated(
        x.astype(jnp.float32), w.astype(jnp.float32),
        window_strides=(2, 2), padding=((1, 1), (1, 1)),
        dimension_numbers=("NCHW", "OIHW", "NCHW"),
    ) + b.reshape(1, -1, 1, 1)
    mean = jnp.mean(y, axis=(0, 2, 3), keepdims=True)
    var = jnp.mean((y - mean) ** 2, axis=(0, 2, 3), keepdims=True)  # biased
    z = (y - mean) / jnp.sqrt(var + eps)
    z = z * gamma.reshape(1, -1, 1, 1) + beta.reshape(1, -1, 1, 1)
    return jnp.where(z >= 0, z, negative_slope * z)


# -------------------------------- main --------------------------------------

if __name__ == "__main__":
    key = jax.random.PRNGKey(0)
    k_x, k_w, k_b, k_g, k_be = jax.random.split(key, 5)

    N, nin, H, W = 2, 4, 16, 16
    nout = 8

    x = jax.random.normal(k_x, (N, nin, H, W), dtype=jnp.float32)
    # deterministic DCGAN-style init (N(0, 0.02) weights)
    w = 0.02 * jax.random.normal(k_w, (nout, nin, 4, 4), dtype=jnp.float32)
    b = 0.05 * jax.random.normal(k_b, (nout,), dtype=jnp.float32)
    gamma = 1.0 + 0.1 * jax.random.normal(k_g, (nout,), dtype=jnp.float32)
    beta = 0.1 * jax.random.normal(k_be, (nout,), dtype=jnp.float32)

    out = dcgan_conv_forward(x, w, b, gamma, beta)
    out = jax.block_until_ready(out)

    ref = dcgan_conv_reference(x, w, b, gamma, beta)
    assert out.shape == (N, nout, H // 2, W // 2), out.shape
    # bf16 MXU operands + bf16 intermediate slab -> looser tolerance vs f32 ref
    max_err = float(jnp.max(jnp.abs(out - ref)))
    assert jnp.allclose(out, ref, atol=5e-2, rtol=5e-2), max_err

    print("KERNEL_OK")
</pallas_src>

<mosaic_0001>
module attributes {stable_mosaic.version = 11 : i64} {
  func.func @conv_bn_stats_kernel(%arg0: i32, %arg1: i32, %arg2: memref<128x128xbf16, #tpu.memory_space<vmem>>, %arg3: memref<128x128xbf16, #tpu.memory_space<vmem>>, %arg4: memref<1x128xf32, #tpu.memory_space<vmem>>, %arg5: memref<128x128xbf16, #tpu.memory_space<vmem>>, %arg6: memref<1x128xf32, #tpu.memory_space<vmem>>, %arg7: memref<1x128xf32, #tpu.memory_space<vmem>>, %arg8: memref<128x128xf32, #tpu.memory_space<vmem>>) attributes {dimension_semantics = [#tpu.dimension_semantics<arbitrary>, #tpu.dimension_semantics<arbitrary>], iteration_bounds = array<i64: 1, 1>, scalar_prefetch = 0 : i64, scratch_operands = 1 : i64, tpu.core_type = #tpu.core_type<tc>, window_params = [{transform_indices = @transform_0, window_bounds = array<i64: 128, 128>}, {transform_indices = @transform_1, window_bounds = array<i64: 128, 128>}, {pipeline_mode = #tpu.pipeline_mode<synchronous>, transform_indices = @transform_2, window_bounds = array<i64: 1, 128>}, {transform_indices = @transform_3, window_bounds = array<i64: 128, 128>}, {pipeline_mode = #tpu.pipeline_mode<synchronous>, transform_indices = @transform_4, window_bounds = array<i64: 1, 128>}, {pipeline_mode = #tpu.pipeline_mode<synchronous>, transform_indices = @transform_5, window_bounds = array<i64: 1, 128>}]} {
    %c0_i32 = arith.constant 0 : i32
    %0 = arith.cmpi eq, %arg0, %c0_i32 : i32
    %c0_i32_0 = arith.constant 0 : i32
    %1 = arith.cmpi eq, %arg1, %c0_i32_0 : i32
    %2 = arith.andi %0, %1 : i1
    %3 = arith.extui %2 : i1 to i32
    %c0_i32_1 = arith.constant 0 : i32
    %4 = arith.cmpi ne, %3, %c0_i32_1 : i32
    scf.if %4 {
      %cst_13 = arith.constant 0.000000e+00 : f32
      %17 = vector.broadcast %cst_13 : f32 to vector<1x128xf32>
      %c0_14 = arith.constant 0 : index
      %c0_15 = arith.constant 0 : index
      %18 = vector.load %arg6[%c0_14, %c0_15] : memref<1x128xf32, #tpu.memory_space<vmem>>, vector<1x128xf32>
      tpu.vector_store %arg6[%c0_14, %c0_15], %17 {strides = array<i32>} : memref<1x128xf32, #tpu.memory_space<vmem>>, vector<1x128xf32>,
      %cst_16 = arith.constant 0.000000e+00 : f32
      %19 = vector.broadcast %cst_16 : f32 to vector<1x128xf32>
      %c0_17 = arith.constant 0 : index
      %c0_18 = arith.constant 0 : index
      %20 = vector.load %arg7[%c0_17, %c0_18] : memref<1x128xf32, #tpu.memory_space<vmem>>, vector<1x128xf32>
      tpu.vector_store %arg7[%c0_17, %c0_18], %19 {strides = array<i32>} : memref<1x128xf32, #tpu.memory_space<vmem>>, vector<1x128xf32>,
    } else {
    }
    %c0_i32_2 = arith.constant 0 : i32
    %5 = arith.cmpi eq, %arg1, %c0_i32_2 : i32
    %6 = arith.extui %5 : i1 to i32
    %c0_i32_3 = arith.constant 0 : i32
    %7 = arith.cmpi ne, %6, %c0_i32_3 : i32
    scf.if %7 {
      %cst_13 = arith.constant 0.000000e+00 : f32
      %17 = vector.broadcast %cst_13 : f32 to vector<128x128xf32>
      %c0_14 = arith.constant 0 : index
      %c0_15 = arith.constant 0 : index
      %18 = vector.load %arg8[%c0_14, %c0_15] : memref<128x128xf32, #tpu.memory_space<vmem>>, vector<128x128xf32>
      tpu.vector_store %arg8[%c0_14, %c0_15], %17 {strides = array<i32>} : memref<128x128xf32, #tpu.memory_space<vmem>>, vector<128x128xf32>,
    } else {
    }
    %c0 = arith.constant 0 : index
    %c0_4 = arith.constant 0 : index
    %8 = vector.load %arg8[%c0, %c0_4] : memref<128x128xf32, #tpu.memory_space<vmem>>, vector<128x128xf32>
    %c0_5 = arith.constant 0 : index
    %c0_6 = arith.constant 0 : index
    %9 = vector.load %arg2[%c0_5, %c0_6] : memref<128x128xbf16, #tpu.memory_space<vmem>>, vector<128x128xbf16>
    %c0_7 = arith.constant 0 : index
    %c0_8 = arith.constant 0 : index
    %10 = vector.load %arg3[%c0_7, %c0_8] : memref<128x128xbf16, #tpu.memory_space<vmem>>, vector<128x128xbf16>
    %cst = arith.constant dense<0.000000e+00> : vector<128x128xf32>
    %11 = tpu.matmul %9, %10, %cst {dimension_numbers = #tpu.dot_dimension_numbers<[1], [0], [0], [1], [0, 0, 1, 1], [], []>} : vector<128x128xbf16>, vector<128x128xbf16>, vector<128x128xf32> -> vector<128x128xf32>
    %12 = arith.addf %8, %11 : vector<128x128xf32>
    %c0_9 = arith.constant 0 : index
    %c0_10 = arith.constant 0 : index
    %13 = vector.load %arg8[%c0_9, %c0_10] : memref<128x128xf32, #tpu.memory_space<vmem>>, vector<128x128xf32>
    tpu.vector_store %arg8[%c0_9, %c0_10], %12 {strides = array<i32>} : memref<128x128xf32, #tpu.memory_space<vmem>>, vector<128x128xf32>,
    %c0_i32_11 = arith.constant 0 : i32
    %14 = arith.cmpi eq, %arg1, %c0_i32_11 : i32
    %15 = arith.extui %14 : i1 to i32
    %c0_i32_12 = arith.constant 0 : i32
    %16 = arith.cmpi ne, %15, %c0_i32_12 : i32
    scf.if %16 {
      %c0_13 = arith.constant 0 : index
      %c0_14 = arith.constant 0 : index
      %17 = vector.load %arg8[%c0_13, %c0_14] : memref<128x128xf32, #tpu.memory_space<vmem>>, vector<128x128xf32>
      %c0_15 = arith.constant 0 : index
      %c0_16 = arith.constant 0 : index
      %18 = vector.load %arg4[%c0_15, %c0_16] : memref<1x128xf32, #tpu.memory_space<vmem>>, vector<1x128xf32>
      %19 = vector.broadcast %18 : vector<1x128xf32> to vector<128x128xf32>
      %20 = arith.addf %17, %19 : vector<128x128xf32>
      %21 = arith.truncf %20 : vector<128x128xf32> to vector<128x128xbf16>
      %c0_17 = arith.constant 0 : index
      %c0_18 = arith.constant 0 : index
      %22 = vector.load %arg5[%c0_17, %c0_18] : memref<128x128xbf16, #tpu.memory_space<vmem>>, vector<128x128xbf16>
      tpu.vector_store %arg5[%c0_17, %c0_18], %21 {strides = array<i32>} : memref<128x128xbf16, #tpu.memory_space<vmem>>, vector<128x128xbf16>,
      %c0_19 = arith.constant 0 : index
      %c0_20 = arith.constant 0 : index
      %23 = vector.load %arg6[%c0_19, %c0_20] : memref<1x128xf32, #tpu.memory_space<vmem>>, vector<1x128xf32>
      %cst_21 = arith.constant dense<0.000000e+00> : vector<128xf32>
      %24 = vector.multi_reduction <add>, %20, %cst_21 [0] : vector<128x128xf32> to vector<128xf32>
      %25 = vector.shape_cast %24 : vector<128xf32> to vector<1x128xf32>
      %26 = arith.addf %23, %25 : vector<1x128xf32>
      %c0_22 = arith.constant 0 : index
      %c0_23 = arith.constant 0 : index
      %27 = vector.load %arg6[%c0_22, %c0_23] : memref<1x128xf32, #tpu.memory_space<vmem>>, vector<1x128xf32>
      tpu.vector_store %arg6[%c0_22, %c0_23], %26 {strides = array<i32>} : memref<1x128xf32, #tpu.memory_space<vmem>>, vector<1x128xf32>,
      %c0_24 = arith.constant 0 : index
      %c0_25 = arith.constant 0 : index
      %28 = vector.load %arg7[%c0_24, %c0_25] : memref<1x128xf32, #tpu.memory_space<vmem>>, vector<1x128xf32>
      %29 = arith.mulf %20, %20 : vector<128x128xf32>
      %cst_26 = arith.constant dense<0.000000e+00> : vector<128xf32>
      %30 = vector.multi_reduction <add>, %29, %cst_26 [0] : vector<128x128xf32> to vector<128xf32>
      %31 = vector.shape_cast %30 : vector<128xf32> to vector<1x128xf32>
      %32 = arith.addf %28, %31 : vector<1x128xf32>
      %c0_27 = arith.constant 0 : index
      %c0_28 = arith.constant 0 : index
      %33 = vector.load %arg7[%c0_27, %c0_28] : memref<1x128xf32, #tpu.memory_space<vmem>>, vector<1x128xf32>
      tpu.vector_store %arg7[%c0_27, %c0_28], %32 {strides = array<i32>} : memref<1x128xf32, #tpu.memory_space<vmem>>, vector<1x128xf32>,
    } else {
    }
    return
  }
  func.func @transform_0(%arg0: i32, %arg1: i32) -> (i32, i32) {
    %c0_i32 = arith.constant 0 : i32
    return %arg0, %arg1 : i32, i32
  }
  func.func @transform_1(%arg0: i32, %arg1: i32) -> (i32, i32) {
    %c0_i32 = arith.constant 0 : i32
    %c0_i32_0 = arith.constant 0 : i32
    return %arg1, %c0_i32 : i32, i32
  }
  func.func @transform_2(%arg0: i32, %arg1: i32) -> (i32, i32) {
    %c0_i32 = arith.constant 0 : i32
    %c0_i32_0 = arith.constant 0 : i32
    %c0_i32_1 = arith.constant 0 : i32
    return %c0_i32, %c0_i32_0 : i32, i32
  }
  func.func @transform_3(%arg0: i32, %arg1: i32) -> (i32, i32) {
    %c0_i32 = arith.constant 0 : i32
    %c0_i32_0 = arith.constant 0 : i32
    return %arg0, %c0_i32 : i32, i32
  }
  func.func @transform_4(%arg0: i32, %arg1: i32) -> (i32, i32) {
    %c0_i32 = arith.constant 0 : i32
    %c0_i32_0 = arith.constant 0 : i32
    %c0_i32_1 = arith.constant 0 : i32
    return %c0_i32, %c0_i32_0 : i32, i32
  }
  func.func @transform_5(%arg0: i32, %arg1: i32) -> (i32, i32) {
    %c0_i32 = arith.constant 0 : i32
    %c0_i32_0 = arith.constant 0 : i32
    %c0_i32_1 = arith.constant 0 : i32
    return %c0_i32, %c0_i32_0 : i32, i32
  }
}

</mosaic_0001>

<bundles_post_ra>
// kernel: tpu_custom_call.1
= control target key start
LH: loop header
LB: loop body
LE: loop exit
PB: predicated region body
PF: predicated region fallthrough
CT: control target
= control target key end

     0   :  { %11 = vsyncpa [#allocation4], 0  ;;  %s960_s0 = inlined_call_operand.hbm [shape: bf16[128,128], index: 0, kind: input, shape index: {}]   ;;  %s961_s1 = inlined_call_operand.hbm [shape: bf16[128,128], index: 1, kind: input, shape index: {}]   ;;  %s962_s2 = inlined_call_operand.vmem [shape: f32[1,128], index: 2, kind: input, shape index: {}]   ;;  %s963_s3 = inlined_call_operand.hbm [shape: bf16[128,128], index: 3, kind: output, shape index: {0}]   ;;  %s964_s4 = inlined_call_operand.hbm [shape: f32[1,128], index: 4, kind: output, shape index: {1}]   ;;  %s965_s5 = inlined_call_operand.hbm [shape: f32[1,128], index: 5, kind: output, shape index: {2}]  }
   0x1   :  { %12 = vsyncpa [#allocation7], 0 }
   0x2   :  { %13 = vsyncpa [#allocation5], 0 }
   0x3   :  { %14 = vsyncpa [#allocation10], 0  ;;  %s871_s18 = smov [#allocation3]  }
   0x4   :  { %s20_s19 = sshll.u32 %s871_s18, 4  ;;  %s21_s19 = int_to_ptr.vmem [resolvable:$true] %s20_s19 }
   0x5   :  { %s771_s20 = scalar_lea.vmem %s21_s19, 1024  ;;  %p776_p1 = scmp.lt.s32.totalorder %s21_s19, %s21_s19 }
   0x6   :  { %p772_p0 = scmp.ne.s32.totalorder %s21_s19, %s771_s20  ;;  %p777_p2 = scmp.lt.s32.totalorder %s771_s20, %s771_s20 }
   0x8   :  { %p778_p3 = por %p777_p2, %p776_p1 }
   0xa   :  { %p779_p4 = pnand %p778_p3, %p772_p0 }
   0xc   :  { %782 = shalt.err (!%p779_p4)
}
   0xd   :  { %s872_s21 = smov 64   ;;  %s873_s22 = smov 4  }
   0xe   :  { %26 = dma.hbm_to_vmem [thread:$0]  %s960_s0, 1024, %s21_s19, [#allocation4], %s872_s21, %s872_s21, %s873_s22  }
   0xf   :  { %s874_s25 = smov [#allocation6]  }
  0x10   :  { %s32_s26 = sshll.u32 %s874_s25, 4  ;;  %s33_s26 = int_to_ptr.vmem [resolvable:$true] %s32_s26 }
  0x11   :  { %s791_s27 = scalar_lea.vmem %s33_s26, 1024  ;;  %p796_p6 = scmp.lt.s32.totalorder %s33_s26, %s33_s26 }
  0x12   :  { %p792_p5 = scmp.ne.s32.totalorder %s33_s26, %s791_s27  ;;  %p797_p7 = scmp.lt.s32.totalorder %s791_s27, %s791_s27 }
  0x14   :  { %p798_p8 = por %p797_p7, %p796_p6 }
  0x16   :  { %p799_p9 = pnand %p798_p8, %p792_p5 }
  0x18   :  { %802 = shalt.err (!%p799_p9)
}
  0x19   :  { %38 = dma.hbm_to_vmem [thread:$0]  %s961_s1, 1024, %s33_s26, [#allocation7], %s872_s21, %s872_s21, %s873_s22  }
  0x1a   :  { %863 = dma.done.wait [#allocation4], 1024  }
  0x1b   :  { %864 = vsyncadd [#allocation4], 4294966272 }
  0x1c   :  { %865 = dma.done.wait [#allocation7], 1024  }
  0x1d   :  { %866 = vsyncadd [#allocation7], 4294966272  ;;  %v747_v0 = vld [vmem:[#allocation6 + $0x38] sm:$0xff]   ;;  %v748_v1 = vld [vmem:[#allocation6 + $0x30] sm:$0xff]   ;;  %v875_v16 = vmov 0.0  }
  0x1e   :  { %691 = vmatprep.subr.bf16.mxu0 %v747_v0  ;;  %723 = vmatprep.subr.bf16.mxu1 %v747_v0  ;;  %v749_v2 = vld [vmem:[#allocation6 + $0x28] sm:$0xff]   ;;  %v750_v3 = vld [vmem:[#allocation6 + $0x20] sm:$0xff]   ;;  %v751_v5 = vld [vmem:[#allocation6 + $0x18] sm:$0xff]   ;;  %54 = vst [vmem:[#allocation9] sm:$0x1] %v875_v16 }
  0x1f   :  { %692 = vmatpush3.bf16.msra.mxu0 %v747_v0  ;;  %731 = vmatpush3.bf16.msra.mxu1 %v747_v0  ;;  %v755_v4 = vld [vmem:[#allocation3] sm:$0xff]   ;;  %v752_v7 = vld [vmem:[#allocation6 + $0x10] sm:$0xff]   ;;  %v753_v8 = vld [vmem:[#allocation6 + $0x8] sm:$0xff]   ;;  %55 = vst [vmem:[#allocation11] sm:$0x1] %v875_v16 }
  0x20   :  { %693 = vmatprep.subr.bf16.mxu0 %v748_v1  ;;  %724 = vmatprep.subr.bf16.mxu1 %v748_v1  ;;  %v759_v6 = vld [vmem:[#allocation3 + $0x20] sm:$0xff]   ;;  %v756_v10 = vld [vmem:[#allocation3 + $0x8] sm:$0xff]   ;;  %v757_v12 = vld [vmem:[#allocation3 + $0x10] sm:$0xff]  }
  0x21   :  { %707 = vmatprep.mubr.bf16.mxu0 %v755_v4  ;;  %715 = vmatprep.mubr.bf16.mxu1 %v759_v6  ;;  %v754_v9 = vld [vmem:[#allocation6] sm:$0xff]   ;;  %v760_v11 = vld [vmem:[#allocation3 + $0x28] sm:$0xff]   ;;  %v761_v13 = vld [vmem:[#allocation3 + $0x30] sm:$0xff]  }
  0x22   :  { %v758_v14 = vld [vmem:[#allocation3 + $0x18] sm:$0xff]   ;;  %v595_v19 = vld [vmem:[%s962_s2] ss:$0 sm:$0xff]  ;;  %s876_s2 = smov [#allocation8]  }
  0x23   :  { %694 = vmatpush3.bf16.msra.mxu0 %v748_v1  ;;  %732 = vmatpush3.bf16.msra.mxu1 %v748_v1  ;;  %v762_v15 = vld [vmem:[#allocation3 + $0x38] sm:$0xff]   ;;  %s539_s30 = sshll.u32 %s876_s2, 4  ;;  %s540_s30 = int_to_ptr.vmem [resolvable:$true] %s539_s30 }
  0x24   :  { %695 = vmatprep.subr.bf16.mxu0 %v749_v2  ;;  %725 = vmatprep.subr.bf16.mxu1 %v749_v2  ;;  %s803_s6 = scalar_lea.vmem %s540_s30, 1024  ;;  %p808_p11 = scmp.lt.s32.totalorder %s540_s30, %s540_s30 }
  0x25   :  { %p804_p10 = scmp.ne.s32.totalorder %s540_s30, %s803_s6  ;;  %p809_p12 = scmp.lt.s32.totalorder %s803_s6, %s803_s6 }
  0x27   :  { %696 = vmatpush3.bf16.msra.mxu0 %v749_v2  ;;  %733 = vmatpush3.bf16.msra.mxu1 %v749_v2  ;;  %p810_p13 = por %p809_p12, %p808_p11 }
  0x28   :  { %697 = vmatprep.subr.bf16.mxu0 %v750_v3  ;;  %726 = vmatprep.subr.bf16.mxu1 %v750_v3 }
  0x29   :  { %p811_p0 = pnand %p810_p13, %p804_p10 }
  0x2b   :  { %698 = vmatpush3.bf16.msra.mxu0 %v750_v3  ;;  %734 = vmatpush3.bf16.msra.mxu1 %v750_v3 }
  0x2c   :  { %699 = vmatprep.subr.bf16.mxu0 %v751_v5  ;;  %727 = vmatprep.subr.bf16.mxu1 %v751_v5 }
  0x2f   :  { %700 = vmatpush3.bf16.msra.mxu0 %v751_v5  ;;  %735 = vmatpush3.bf16.msra.mxu1 %v751_v5 }
  0x30   :  { %701 = vmatprep.subr.bf16.mxu0 %v752_v7  ;;  %728 = vmatprep.subr.bf16.mxu1 %v752_v7 }
  0x33   :  { %702 = vmatpush3.bf16.msra.mxu0 %v752_v7  ;;  %736 = vmatpush3.bf16.msra.mxu1 %v752_v7 }
  0x34   :  { %703 = vmatprep.subr.bf16.mxu0 %v753_v8  ;;  %729 = vmatprep.subr.bf16.mxu1 %v753_v8 }
  0x37   :  { %704 = vmatpush3.bf16.msra.mxu0 %v753_v8  ;;  %737 = vmatpush3.bf16.msra.mxu1 %v753_v8 }
  0x38   :  { %705 = vmatprep.subr.bf16.mxu0 %v754_v9  ;;  %730 = vmatprep.subr.bf16.mxu1 %v754_v9 }
  0x3b   :  { %706 = vmatpush3.bf16.msra.mxu0 %v754_v9  ;;  %738 = vmatpush3.bf16.msra.mxu1 %v754_v9 }
  0x3e   :  { %708 = vmatmul.mubr.bf16.vlgmr.msra.gmra.mxu0 %v756_v10  ;;  %716 = vmatmul.mubr.bf16.vlgmr.msra.gmra.mxu1 %v760_v11 }
  0x3f   :  { %711 = vmatprep.mubr.bf16.mxu0 %v757_v12  ;;  %719 = vmatprep.mubr.bf16.mxu1 %v761_v13 }
  0x46   :  { %712 = vmatmul.mubr.bf16.gmra.mxu0 %v758_v14  ;;  %720 = vmatmul.mubr.bf16.gmra.mxu1 %v762_v15 }
  0xfe   :  { %v709_v17 = vpop.f32.mrf.mxu0  ;;  %v717_v18 = vpop.f32.mrf.mxu1 }
  0xff   :  { %v924_v22 = vadd.f32 %v717_v18, %v595_v19  ;;  %v376_v25 = vadd.f32 %v709_v17, %v595_v19 }
 0x100   :  { %v253_v20 = vpop.f32.mrf.mxu0  ;;  %v285_v21 = vpop.f32.mrf.mxu1 }
 0x101   :  { %v374_v26 = vadd.f32 %v595_v19, %v253_v20  ;;  %v928_v30 = vadd.f32 %v595_v19, %v285_v21  ;;  %v497_v45 = vmul.f32 %v376_v25, %v376_v25 }
 0x102   :  { %v710_v23 = vpop.f32.mrf.mxu0  ;;  %v718_v24 = vpop.f32.mrf.mxu1 }
 0x103   :  { %v377_v27 = vadd.f32 %v710_v23, %v595_v19  ;;  %v926_v28 = vadd.f32 %v718_v24, %v595_v19  ;;  %v495_v38 = vmul.f32 %v374_v26, %v374_v26 }
 0x104   :  { %v256_v29 = vpop.f32.mrf.mxu0  ;;  %v288_v31 = vpop.f32.mrf.mxu1 }
 0x105   :  { %v636_v32 = vpack.c.bf16 %v377_v27, %v376_v25  ;;  %v375_v33 = vadd.f32 %v595_v19, %v256_v29  ;;  %v656_v34 = vpack.c.bf16 %v926_v28, %v924_v22  ;;  %v932_v36 = vadd.f32 %v595_v19, %v288_v31 }
 0x106   :  { %v713_v35 = vpop.f32.mrf.mxu0  ;;  %v721_v37 = vpop.f32.mrf.mxu1  ;;  %v498_v49 = vmul.f32 %v377_v27, %v377_v27 }
 0x107   :  { %668 = vst [vmem:[#allocation8 + $0x8] sm:$0xff] %v636_v32   ;;  %v631_v39 = vpack.c.bf16 %v375_v33, %v374_v26  ;;  %v471_v40 = vadd.f32 %v375_v33, %v374_v26  ;;  %v496_v41 = vmul.f32 %v375_v33, %v375_v33  ;;  %672 = vst [vmem:[#allocation8 + $0x28] sm:$0xff] %v656_v34  }
 0x108   :  { %v269_v42 = vpop.f32.mrf.mxu0  ;;  %v651_v43 = vpack.c.bf16 %v932_v36, %v928_v30  ;;  %v301_v44 = vpop.f32.mrf.mxu1  ;;  %v388_v51 = vadd.f32 %v721_v37, %v595_v19  ;;  %v380_v54 = vadd.f32 %v713_v35, %v595_v19 }
 0x109   :  { %632 = vst [vmem:[#allocation8] sm:$0xff] %v631_v39   ;;  %v472_v46 = vadd.f32 %v471_v40, %v376_v25  ;;  %v511_v47 = vadd.f32 %v496_v41, %v495_v38  ;;  %v378_v48 = vadd.f32 %v595_v19, %v269_v42  ;;  %v386_v58 = vadd.f32 %v595_v19, %v301_v44 }
 0x10a   :  { %v714_v50 = vpop.f32.mrf.mxu0  ;;  %671 = vst [vmem:[#allocation8 + $0x20] sm:$0xff] %v651_v43   ;;  %v722_v52 = vpop.f32.mrf.mxu1  ;;  %v501_v9 = vmul.f32 %v380_v54, %v380_v54 }
 0x10b   :  { %v512_v53 = vadd.f32 %v511_v47, %v497_v45  ;;  %v473_v55 = vadd.f32 %v472_v46, %v377_v27  ;;  %v381_v56 = vadd.f32 %v714_v50, %v595_v19  ;;  %v389_v59 = vadd.f32 %v722_v52, %v595_v19 }
 0x10c   :  { %v272_v57 = vpop.f32.mrf.mxu0  ;;  %v304_v60 = vpop.f32.mrf.mxu1  ;;  %v499_v62 = vmul.f32 %v378_v48, %v378_v48 }
 0x10d   :  { %v474_v61 = vadd.f32 %v473_v55, %v378_v48  ;;  %v513_v63 = vadd.f32 %v512_v53, %v498_v49  ;;  %v646_v0 = vpack.c.bf16 %v381_v56, %v380_v54  ;;  %v379_v1 = vadd.f32 %v595_v19, %v272_v57 }
 0x10e   :  { %v666_v2 = vpack.c.bf16 %v389_v59, %v388_v51  ;;  %v387_v3 = vadd.f32 %v595_v19, %v304_v60 }
 0x10f   :  { %v514_v4 = vadd.f32 %v513_v63, %v499_v62  ;;  %670 = vst [vmem:[#allocation8 + $0x18] sm:$0xff] %v646_v0   ;;  %v641_v5 = vpack.c.bf16 %v379_v1, %v378_v48  ;;  %v475_v6 = vadd.f32 %v474_v61, %v379_v1  ;;  %v500_v7 = vmul.f32 %v379_v1, %v379_v1 }
 0x110   :  { %674 = vst [vmem:[#allocation8 + $0x38] sm:$0xff] %v666_v2   ;;  %v661_v8 = vpack.c.bf16 %v387_v3, %v386_v58 }
 0x111   :  { %669 = vst [vmem:[#allocation8 + $0x10] sm:$0xff] %v641_v5   ;;  %v476_v10 = vadd.f32 %v475_v6, %v380_v54  ;;  %v515_v11 = vadd.f32 %v514_v4, %v500_v7 }
 0x112   :  { %673 = vst [vmem:[#allocation8 + $0x30] sm:$0xff] %v661_v8  }
 0x113   :  { %814 = shalt.err (!%p811_p0)
}
 0x114   :  { %545 = dma.vmem_to_hbm [thread:$0]  %s540_s30, 1024, %s963_s3, [#allocation5], %s872_s21, %s872_s21, %s873_s22   ;;  %v502_v12 = vmul.f32 %v381_v56, %v381_v56  ;;  %v516_v13 = vadd.f32 %v515_v11, %v501_v9  ;;  %v477_v14 = vadd.f32 %v476_v10, %v381_v56  ;;  %v503_v15 = vmul.f32 %v928_v30, %v928_v30  ;;  %v470_v49 = vld [vmem:[#allocation9] sm:$0x1] }
 0x115   :  { %v504_v19 = vmul.f32 %v932_v36, %v932_v36  ;;  %v505_v21 = vmul.f32 %v924_v22, %v924_v22  ;;  %v506_v25 = vmul.f32 %v926_v28, %v926_v28  ;;  %v508_v34 = vmul.f32 %v387_v3, %v387_v3  ;;  %s877_s3 = smov [#allocation9]   ;;  %s878_s10 = smov [#allocation11]  }
 0x116   :  { %v478_v16 = vadd.f32 %v477_v14, %v928_v30  ;;  %v517_v17 = vadd.f32 %v516_v13, %v502_v12  ;;  %v507_v30 = vmul.f32 %v386_v58, %v386_v58  ;;  %v509_v35 = vmul.f32 %v388_v51, %v388_v51  ;;  %s552_s9 = sshll.u32 %s877_s3, 4  ;;  %s562_s11 = sshll.u32 %s878_s10, 4  ;;  %s553_s9 = int_to_ptr.vmem [resolvable:$true] %s552_s9  ;;  %s563_s11 = int_to_ptr.vmem [resolvable:$true] %s562_s11 }
 0x117   :  { %v510_v38 = vmul.f32 %v389_v59, %v389_v59  ;;  %s823_s12 = scalar_lea.vmem %s553_s9, 16  ;;  %s827_s13 = scalar_lea.vmem %s553_s9, 32 }
 0x118   :  { %v479_v18 = vadd.f32 %v478_v16, %v932_v36  ;;  %v518_v20 = vadd.f32 %v517_v17, %v503_v15  ;;  %p824_p1 = scmp.ne.s32.totalorder %s553_s9, %s823_s12  ;;  %p828_p2 = scmp.lt.s32.totalorder %s553_s9, %s553_s9 }
 0x119   :  { %p829_p3 = scmp.lt.s32.totalorder %s827_s13, %s823_s12 }
 0x11a   :  { %v480_v23 = vadd.f32 %v479_v18, %v924_v22  ;;  %v519_v24 = vadd.f32 %v518_v20, %v504_v19 }
 0x11b   :  { %p830_p4 = por %p829_p3, %p828_p2 }
 0x11c   :  { %v520_v26 = vadd.f32 %v519_v24, %v505_v21  ;;  %v481_v27 = vadd.f32 %v480_v23, %v926_v28 }
 0x11d   :  { %p831_p5 = pnand %p830_p4, %p824_p1 }
 0x11e   :  { %v482_v29 = vadd.f32 %v481_v27, %v386_v58  ;;  %v521_v31 = vadd.f32 %v520_v26, %v506_v25 }
 0x120   :  { %v522_v32 = vadd.f32 %v521_v31, %v507_v30  ;;  %v483_v33 = vadd.f32 %v482_v29, %v387_v3 }
 0x122   :  { %v484_v36 = vadd.f32 %v483_v33, %v388_v51  ;;  %v523_v37 = vadd.f32 %v522_v32, %v508_v34  ;;  %v494_v51 = vld [vmem:[#allocation11] sm:$0x1] }
 0x124   :  { %v485_v39 = vadd.f32 %v484_v36, %v389_v59  ;;  %v524_v40 = vadd.f32 %v523_v37, %v509_v35 }
 0x126   :  { %v486_v22 = vrot.slane %v485_v39, 4  ;;  %v525_v41 = vadd.f32 %v524_v40, %v510_v38 }
 0x128   :  { %v487_v42 = vadd.f32 %v486_v22, %v485_v39  ;;  %v526_v43 = vrot.slane %v525_v41, 4 }
 0x12a   :  { %v527_v44 = vadd.f32 %v526_v43, %v525_v41  ;;  %v488_v45 = vrot.slane %v487_v42, 2 }
 0x12c   :  { %v489_v46 = vadd.f32 %v488_v45, %v487_v42  ;;  %v528_v28 = vrot.slane %v527_v44, 2 }
 0x12e   :  { %v490_v47 = vrot.slane %v489_v46, 1  ;;  %v529_v48 = vadd.f32 %v528_v28, %v527_v44 }
 0x130   :  { %v491_v50 = vadd.f32 %v490_v47, %v489_v46  ;;  %v530_v52 = vrot.slane %v529_v48, 1 }
 0x132   :  { %v492_v53 = vadd.f32 %v491_v50, %v470_v49  ;;  %v531_v54 = vadd.f32 %v530_v52, %v529_v48 }
 0x134   :  { %493 = vst [vmem:[#allocation9] sm:$0x1] %v492_v53  ;;  %v532_v55 = vadd.f32 %v531_v54, %v494_v51 }
 0x135   :  { %834 = shalt.err (!%p831_p5)
}
 0x136   :  { %555 = dma.vmem_to_hbm [thread:$0]  %s553_s9, 16, %s964_s4, [#allocation10]   ;;  %533 = vst [vmem:[#allocation11] sm:$0x1] %v532_v55 }
 0x137   :  { %s843_s16 = scalar_lea.vmem %s563_s11, 16  ;;  %s847_s17 = scalar_lea.vmem %s563_s11, 32 }
 0x138   :  { %p844_p6 = scmp.ne.s32.totalorder %s563_s11, %s843_s16  ;;  %p848_p7 = scmp.lt.s32.totalorder %s563_s11, %s563_s11 }
 0x139   :  { %p849_p8 = scmp.lt.s32.totalorder %s847_s17, %s843_s16 }
 0x13b   :  { %p850_p9 = por %p849_p8, %p848_p7 }
 0x13d   :  { %p851_p10 = pnand %p850_p9, %p844_p6 }
 0x13f   :  { %854 = shalt.err (!%p851_p10)
}
 0x140   :  { %565 = dma.vmem_to_hbm [thread:$0]  %s563_s11, 16, %s965_s5, [#allocation10]  }
 0x141   :  { %867 = dma.done.wait [#allocation5], 1024  }
 0x142   :  { %868 = vsyncadd [#allocation5], 4294966272 }
 0x143   :  { %869 = dma.done.wait [#allocation10], 32  }
 0x144   :  { %870 = vsyncadd [#allocation10], 4294967264 }
 0x145   :  { %575 = vsyncpa [#allocation4], 1 }
 0x146   :  { %576 = vsyncpa [#allocation7], 1 }
 0x147   :  { %577 = vsyncpa [#allocation5], 1 }
 0x148   :  { %578 = vsyncpa [#allocation10], 1 }

</bundles_post_ra>
